<compile_context>
chip_gen: v7x
topology: tpu7x:2x2x1
jax: 0.10.0
libtpu: 0.0.40
codegen_flags: <defaults>
</compile_context>

<pallas_src>
import jax
import jax.numpy as jnp
from jax.experimental import pallas as pl
from jax.experimental.pallas import tpu as pltpu

HIDDEN = 256
OUT_PAD = 128  # lane-dense output width (action_dim padded up to one full lane tile)


def _default_epilogue_dtype():
    """bf16 bias-add/ReLU on chips with bf16 VALUs (v6e/v7x); f32 otherwise (v5e)."""
    try:
        kind = jax.devices()[0].device_kind.lower()
    except Exception:
        return jnp.float32
    if "v6" in kind or "v7" in kind:
        return jnp.bfloat16
    return jnp.float32


def make_actor_kernel(epilogue_dtype):
    def actor_kernel(x_ref, w1_ref, b1_ref, w2_ref, b2_ref, w3_ref, b3_ref, o_ref):
        # In-kernel cast of the state tile to bf16 for the MXU.
        x = x_ref[...].astype(jnp.bfloat16)

        # Layer 1: bf16 MXU operands, f32 accumulation; bias + ReLU in epilogue_dtype.
        h1 = jnp.dot(x, w1_ref[...], preferred_element_type=jnp.float32)
        h1 = jnp.maximum(h1.astype(epilogue_dtype) + b1_ref[...], 0.0)

        # Layer 2.
        h2 = jnp.dot(h1.astype(jnp.bfloat16), w2_ref[...],
                     preferred_element_type=jnp.float32)
        h2 = jnp.maximum(h2.astype(epilogue_dtype) + b2_ref[...], 0.0)

        # Output layer (padded to 128 lanes; padding columns have zero W/b).
        out = jnp.dot(h2.astype(jnp.bfloat16), w3_ref[...],
                      preferred_element_type=jnp.float32)
        o_ref[...] = (out + b3_ref[...]).astype(o_ref.dtype)

    return actor_kernel


def init_params(key, state_dim, action_dim, hidden=HIDDEN):
    """f32 params mimicking torch.nn.Linear's U(-1/sqrt(fan_in), 1/sqrt(fan_in))."""
    keys = jax.random.split(key, 6)

    def linear(kw, kb, fan_in, fan_out):
        bound = 1.0 / jnp.sqrt(jnp.float32(fan_in))
        W = jax.random.uniform(kw, (fan_in, fan_out), jnp.float32, -bound, bound)
        b = jax.random.uniform(kb, (1, fan_out), jnp.float32, -bound, bound)
        return W, b

    W1, b1 = linear(keys[0], keys[1], state_dim, hidden)
    W2, b2 = linear(keys[2], keys[3], hidden, hidden)
    W3, b3 = linear(keys[4], keys[5], hidden, action_dim)
    return {"W1": W1, "b1": b1, "W2": W2, "b2": b2, "W3": W3, "b3": b3}


def pack_params(p, epilogue_dtype=jnp.float32):
    """bf16 weights; output layer zero-padded to OUT_PAD lanes; b1/b2 in epilogue dtype."""
    action_dim = p["W3"].shape[1]
    assert action_dim <= OUT_PAD
    W3 = jnp.pad(p["W3"], ((0, 0), (0, OUT_PAD - action_dim)))
    b3 = jnp.pad(p["b3"], ((0, 0), (0, OUT_PAD - action_dim)))
    return {
        "W1": p["W1"].astype(jnp.bfloat16),
        "W2": p["W2"].astype(jnp.bfloat16),
        "W3": W3.astype(jnp.bfloat16),
        "b1": p["b1"].astype(epilogue_dtype),
        "b2": p["b2"].astype(epilogue_dtype),
        "b3": b3.astype(jnp.float32),
        "action_dim": action_dim,
        "epilogue_dtype": epilogue_dtype,
    }


def _round_up(v, m):
    return ((v + m - 1) // m) * m


def actor_forward(state, packed, block_b=1024):
    """state: (B, state_dim) f32; packed: output of pack_params. Returns (B, action_dim) f32."""
    B, state_dim = state.shape
    action_dim = packed["action_dim"]
    epilogue_dtype = packed["epilogue_dtype"]

    # Batch tile: multiple of 16 (sublane packing for the bf16 output tile), capped at
    # block_b, and never larger than ceil(B/2) rounded up -> at least 2 grid steps for
    # any B > 16 so v7x's second TensorCore gets work; v5e/v6e are unaffected.
    half = _round_up(pl.cdiv(B, 2), 16)
    bb = max(16, min(block_b, half))
    num_tiles = pl.cdiv(B, bb)
    B_pad = num_tiles * bb

    x = state
    if B_pad != B:
        x = jnp.pad(x, ((0, B_pad - B), (0, 0)))

    # Weights/biases: same (0, 0) block every grid step -> stay VMEM-resident.
    resident = lambda shape: pl.BlockSpec(shape, lambda i: (0, 0))

    out = pl.pallas_call(
        make_actor_kernel(epilogue_dtype),
        out_shape=jax.ShapeDtypeStruct((B_pad, OUT_PAD), jnp.bfloat16),
        grid=(num_tiles,),
        in_specs=[
            pl.BlockSpec((bb, state_dim), lambda i: (i, 0)),
            resident(packed["W1"].shape),
            resident(packed["b1"].shape),
            resident(packed["W2"].shape),
            resident(packed["b2"].shape),
            resident(packed["W3"].shape),
            resident(packed["b3"].shape),
        ],
        out_specs=pl.BlockSpec((bb, OUT_PAD), lambda i: (i, 0)),
        compiler_params=pltpu.CompilerParams(
            dimension_semantics=("parallel",)),
    )(x, packed["W1"], packed["b1"], packed["W2"], packed["b2"],
      packed["W3"], packed["b3"])

    return out[:B, :action_dim].astype(jnp.float32)


def actor_reference_f32(state, p):
    h1 = jnp.maximum(state @ p["W1"] + p["b1"], 0.0)
    h2 = jnp.maximum(h1 @ p["W2"] + p["b2"], 0.0)
    return h2 @ p["W3"] + p["b3"]


def actor_reference_kernel_numerics(state, p, epilogue_dtype):
    """Reference that mimics the kernel's numerics (bf16 MXU operands, f32 accumulation,
    epilogue in epilogue_dtype, bf16 output rounding)."""
    bf = jnp.bfloat16
    h1 = jnp.dot(state.astype(bf), p["W1"].astype(bf),
                 preferred_element_type=jnp.float32)
    h1 = jnp.maximum(h1.astype(epilogue_dtype) + p["b1"].astype(epilogue_dtype), 0.0)
    h2 = jnp.dot(h1.astype(bf), p["W2"].astype(bf),
                 preferred_element_type=jnp.float32)
    h2 = jnp.maximum(h2.astype(epilogue_dtype) + p["b2"].astype(epilogue_dtype), 0.0)
    out = jnp.dot(h2.astype(bf), p["W3"].astype(bf),
                  preferred_element_type=jnp.float32) + p["b3"]
    return out.astype(bf).astype(jnp.float32)


if __name__ == "__main__":
    key = jax.random.PRNGKey(0)
    k_state, k_params, k_big = jax.random.split(key, 3)

    state_dim = 32
    action_dim = 8

    epilogue_dtype = _default_epilogue_dtype()
    params = init_params(k_params, state_dim, action_dim)
    packed = pack_params(params, epilogue_dtype)

    # --- small batch (typical RL inference shape) -------------------------
    batch = 8
    state = jax.random.normal(k_state, (batch, state_dim), jnp.float32)

    out = jax.block_until_ready(actor_forward(state, packed))
    assert out.shape == (batch, action_dim)
    assert out.dtype == jnp.float32

    ref_kern = actor_reference_kernel_numerics(state, params, epilogue_dtype)
    ref_f32 = actor_reference_f32(state, params)
    assert jnp.allclose(out, ref_kern, atol=5e-3, rtol=5e-3)
    assert jnp.allclose(out, ref_f32, atol=1e-1, rtol=1e-1)

    # --- larger, non-multiple batch: exercises padding + >=2-tile grid ----
    big_batch = 300
    big_state = jax.random.normal(k_big, (big_batch, state_dim), jnp.float32)
    big_out = jax.block_until_ready(actor_forward(big_state, packed, block_b=1024))
    assert big_out.shape == (big_batch, action_dim)
    assert jnp.allclose(
        big_out,
        actor_reference_kernel_numerics(big_state, params, epilogue_dtype),
        atol=5e-3, rtol=5e-3)

    print("KERNEL_OK")
</pallas_src>

<mosaic_0001>
module attributes {stable_mosaic.version = 11 : i64} {
  func.func @actor_kernel(%arg0: i32, %arg1: memref<16x32xf32, #tpu.memory_space<vmem>>, %arg2: memref<32x256xbf16, #tpu.memory_space<vmem>>, %arg3: memref<1x256xf32, #tpu.memory_space<vmem>>, %arg4: memref<256x256xbf16, #tpu.memory_space<vmem>>, %arg5: memref<1x256xf32, #tpu.memory_space<vmem>>, %arg6: memref<256x128xbf16, #tpu.memory_space<vmem>>, %arg7: memref<1x128xf32, #tpu.memory_space<vmem>>, %arg8: memref<16x128xbf16, #tpu.memory_space<vmem>>) attributes {dimension_semantics = [#tpu.dimension_semantics<parallel>], iteration_bounds = array<i64: 1>, scalar_prefetch = 0 : i64, scratch_operands = 0 : i64, tpu.core_type = #tpu.core_type<tc>, window_params = [{transform_indices = @transform_0, window_bounds = array<i64: 16, 32>}, {pipeline_mode = #tpu.pipeline_mode<synchronous>, transform_indices = @transform_1, window_bounds = array<i64: 32, 256>}, {pipeline_mode = #tpu.pipeline_mode<synchronous>, transform_indices = @transform_2, window_bounds = array<i64: 1, 256>}, {pipeline_mode = #tpu.pipeline_mode<synchronous>, transform_indices = @transform_3, window_bounds = array<i64: 256, 256>}, {pipeline_mode = #tpu.pipeline_mode<synchronous>, transform_indices = @transform_4, window_bounds = array<i64: 1, 256>}, {pipeline_mode = #tpu.pipeline_mode<synchronous>, transform_indices = @transform_5, window_bounds = array<i64: 256, 128>}, {pipeline_mode = #tpu.pipeline_mode<synchronous>, transform_indices = @transform_6, window_bounds = array<i64: 1, 128>}, {transform_indices = @transform_7, window_bounds = array<i64: 16, 128>}]} {
    %c0 = arith.constant 0 : index
    %c0_0 = arith.constant 0 : index
    %0 = vector.load %arg1[%c0, %c0_0] : memref<16x32xf32, #tpu.memory_space<vmem>>, vector<16x32xf32>
    %1 = arith.truncf %0 : vector<16x32xf32> to vector<16x32xbf16>
    %c0_1 = arith.constant 0 : index
    %c0_2 = arith.constant 0 : index
    %2 = vector.load %arg2[%c0_1, %c0_2] : memref<32x256xbf16, #tpu.memory_space<vmem>>, vector<32x256xbf16>
    %cst = arith.constant dense<0.000000e+00> : vector<16x256xf32>
    %3 = tpu.matmul %1, %2, %cst {dimension_numbers = #tpu.dot_dimension_numbers<[1], [0], [0], [1], [0, 0, 1, 1], [], []>} : vector<16x32xbf16>, vector<32x256xbf16>, vector<16x256xf32> -> vector<16x256xf32>
    %c0_3 = arith.constant 0 : index
    %c0_4 = arith.constant 0 : index
    %4 = vector.load %arg3[%c0_3, %c0_4] : memref<1x256xf32, #tpu.memory_space<vmem>>, vector<1x256xf32>
    %5 = vector.broadcast %4 : vector<1x256xf32> to vector<16x256xf32>
    %6 = arith.addf %3, %5 : vector<16x256xf32>
    %cst_5 = arith.constant 0.000000e+00 : f32
    %7 = vector.broadcast %cst_5 : f32 to vector<16x256xf32>
    %8 = arith.maximumf %6, %7 : vector<16x256xf32>
    %9 = arith.truncf %8 : vector<16x256xf32> to vector<16x256xbf16>
    %c0_6 = arith.constant 0 : index
    %c0_7 = arith.constant 0 : index
    %10 = vector.load %arg4[%c0_6, %c0_7] : memref<256x256xbf16, #tpu.memory_space<vmem>>, vector<256x256xbf16>
    %cst_8 = arith.constant dense<0.000000e+00> : vector<16x256xf32>
    %11 = tpu.matmul %9, %10, %cst_8 {dimension_numbers = #tpu.dot_dimension_numbers<[1], [0], [0], [1], [0, 0, 1, 1], [], []>} : vector<16x256xbf16>, vector<256x256xbf16>, vector<16x256xf32> -> vector<16x256xf32>
    %c0_9 = arith.constant 0 : index
    %c0_10 = arith.constant 0 : index
    %12 = vector.load %arg5[%c0_9, %c0_10] : memref<1x256xf32, #tpu.memory_space<vmem>>, vector<1x256xf32>
    %13 = vector.broadcast %12 : vector<1x256xf32> to vector<16x256xf32>
    %14 = arith.addf %11, %13 : vector<16x256xf32>
    %cst_11 = arith.constant 0.000000e+00 : f32
    %15 = vector.broadcast %cst_11 : f32 to vector<16x256xf32>
    %16 = arith.maximumf %14, %15 : vector<16x256xf32>
    %17 = arith.truncf %16 : vector<16x256xf32> to vector<16x256xbf16>
    %c0_12 = arith.constant 0 : index
    %c0_13 = arith.constant 0 : index
    %18 = vector.load %arg6[%c0_12, %c0_13] : memref<256x128xbf16, #tpu.memory_space<vmem>>, vector<256x128xbf16>
    %cst_14 = arith.constant dense<0.000000e+00> : vector<16x128xf32>
    %19 = tpu.matmul %17, %18, %cst_14 {dimension_numbers = #tpu.dot_dimension_numbers<[1], [0], [0], [1], [0, 0, 1, 1], [], []>} : vector<16x256xbf16>, vector<256x128xbf16>, vector<16x128xf32> -> vector<16x128xf32>
    %c0_15 = arith.constant 0 : index
    %c0_16 = arith.constant 0 : index
    %20 = vector.load %arg7[%c0_15, %c0_16] : memref<1x128xf32, #tpu.memory_space<vmem>>, vector<1x128xf32>
    %21 = vector.broadcast %20 : vector<1x128xf32> to vector<16x128xf32>
    %22 = arith.addf %19, %21 : vector<16x128xf32>
    %23 = arith.truncf %22 : vector<16x128xf32> to vector<16x128xbf16>
    %c0_17 = arith.constant 0 : index
    %c0_18 = arith.constant 0 : index
    %24 = vector.load %arg8[%c0_17, %c0_18] : memref<16x128xbf16, #tpu.memory_space<vmem>>, vector<16x128xbf16>
    tpu.vector_store %arg8[%c0_17, %c0_18], %23 {strides = array<i32>} : memref<16x128xbf16, #tpu.memory_space<vmem>>, vector<16x128xbf16>,
    return
  }
  func.func @transform_0(%arg0: i32) -> (i32, i32) {
    %c0_i32 = arith.constant 0 : i32
    %c0_i32_0 = arith.constant 0 : i32
    return %arg0, %c0_i32 : i32, i32
  }
  func.func @transform_1(%arg0: i32) -> (i32, i32) {
    %c0_i32 = arith.constant 0 : i32
    %c0_i32_0 = arith.constant 0 : i32
    %c0_i32_1 = arith.constant 0 : i32
    return %c0_i32, %c0_i32_0 : i32, i32
  }
  func.func @transform_2(%arg0: i32) -> (i32, i32) {
    %c0_i32 = arith.constant 0 : i32
    %c0_i32_0 = arith.constant 0 : i32
    %c0_i32_1 = arith.constant 0 : i32
    return %c0_i32, %c0_i32_0 : i32, i32
  }
  func.func @transform_3(%arg0: i32) -> (i32, i32) {
    %c0_i32 = arith.constant 0 : i32
    %c0_i32_0 = arith.constant 0 : i32
    %c0_i32_1 = arith.constant 0 : i32
    return %c0_i32, %c0_i32_0 : i32, i32
  }
  func.func @transform_4(%arg0: i32) -> (i32, i32) {
    %c0_i32 = arith.constant 0 : i32
    %c0_i32_0 = arith.constant 0 : i32
    %c0_i32_1 = arith.constant 0 : i32
    return %c0_i32, %c0_i32_0 : i32, i32
  }
  func.func @transform_5(%arg0: i32) -> (i32, i32) {
    %c0_i32 = arith.constant 0 : i32
    %c0_i32_0 = arith.constant 0 : i32
    %c0_i32_1 = arith.constant 0 : i32
    return %c0_i32, %c0_i32_0 : i32, i32
  }
  func.func @transform_6(%arg0: i32) -> (i32, i32) {
    %c0_i32 = arith.constant 0 : i32
    %c0_i32_0 = arith.constant 0 : i32
    %c0_i32_1 = arith.constant 0 : i32
    return %c0_i32, %c0_i32_0 : i32, i32
  }
  func.func @transform_7(%arg0: i32) -> (i32, i32) {
    %c0_i32 = arith.constant 0 : i32
    %c0_i32_0 = arith.constant 0 : i32
    return %arg0, %c0_i32 : i32, i32
  }
}

</mosaic_0001>

<bundles_post_ra>
// kernel: tpu_custom_call.1
= control target key start
LH: loop header
LB: loop body
LE: loop exit
PB: predicated region body
PF: predicated region fallthrough
CT: control target
= control target key end

     0   :  { %12 = vsyncpa [#allocation3], 0  ;;  %s1064_s0 = inlined_call_operand.hbm [shape: f32[16,32], index: 0, kind: input, shape index: {}]   ;;  %s1065_s1 = inlined_call_operand.hbm [shape: bf16[32,256], index: 1, kind: input, shape index: {}]   ;;  %s1066_s2 = inlined_call_operand.vmem [shape: f32[1,256], index: 2, kind: input, shape index: {}]   ;;  %s1067_s3 = inlined_call_operand.hbm [shape: bf16[256,256], index: 3, kind: input, shape index: {}]   ;;  %s1068_s4 = inlined_call_operand.vmem [shape: f32[1,256], index: 4, kind: input, shape index: {}]   ;;  %s1069_s5 = inlined_call_operand.hbm [shape: bf16[256,128], index: 5, kind: input, shape index: {}]   ;;  %s1070_s6 = inlined_call_operand.vmem [shape: f32[1,128], index: 6, kind: input, shape index: {}]   ;;  %s1071_s7 = inlined_call_operand.hbm [shape: bf16[16,128], index: 7, kind: output, shape index: {}]  }
   0x1   :  { %13 = vsyncpa [#allocation6], 0 }
   0x2   :  { %14 = vsyncpa [#allocation9], 0 }
   0x3   :  { %15 = vsyncpa [#allocation4], 0  ;;  %s916_s24 = smov [#allocation5]   ;;  %s917_s26 = smov [#allocation2]  }
   0x4   :  { %s33_s25 = sshll.u32 %s916_s24, 4  ;;  %s21_s27 = sshll.u32 %s917_s26, 4  ;;  %s34_s25 = int_to_ptr.vmem [resolvable:$true] %s33_s25  ;;  %s966_s27 = int_to_ptr.vmem [resolvable:$true] %s21_s27 }
   0x5   :  { %s798_s30 = scalar_lea.hbm %s1065_s1, 512 }
   0x6   :  { %p799_p0 = scmp.ne.s32.totalorder %s1065_s1, %s798_s30  ;;  %p802_p1 = scmp.lt.u32.totalorder %s798_s30, %s1065_s1 }
   0x8   :  { %p804_p2 = pnand %p802_p1, %p799_p0 }
   0xa   :  { %807 = shalt.err (!%p804_p2)
}
   0xb   :  { %s808_s12 = scalar_lea.vmem %s34_s25, 512  ;;  %p813_p4 = scmp.lt.s32.totalorder %s34_s25, %s34_s25 }
   0xc   :  { %p809_p3 = scmp.ne.s32.totalorder %s34_s25, %s808_s12  ;;  %p814_p5 = scmp.lt.s32.totalorder %s808_s12, %s808_s12 }
   0xe   :  { %p815_p6 = por %p814_p5, %p813_p4 }
  0x10   :  { %p816_p7 = pnand %p815_p6, %p809_p3 }
  0x12   :  { %819 = shalt.err (!%p816_p7)
}
  0x13   :  { %s918_s13 = smov 128   ;;  %s919_s14 = smov 8  }
  0x14   :  { %39 = dma.hbm_to_vmem [thread:$0]  %s1065_s1, 512, %s34_s25, [#allocation6], %s918_s13, %s918_s13, %s919_s14  }
  0x15   :  { %s820_s19 = scalar_lea.hbm %s1064_s0, 256 }
  0x16   :  { %p821_p8 = scmp.ne.s32.totalorder %s1064_s0, %s820_s19  ;;  %p824_p9 = scmp.lt.u32.totalorder %s820_s19, %s1064_s0 }
  0x18   :  { %p826_p10 = pnand %p824_p9, %p821_p8 }
  0x1a   :  { %829 = shalt.err (!%p826_p10)
}
  0x1b   :  { %s830_s24 = scalar_lea.vmem %s966_s27, 256  ;;  %p835_p12 = scmp.lt.s32.totalorder %s966_s27, %s966_s27 }
  0x1c   :  { %p831_p11 = scmp.ne.s32.totalorder %s966_s27, %s830_s24  ;;  %p836_p13 = scmp.lt.s32.totalorder %s830_s24, %s830_s24 }
  0x1e   :  { %p837_p0 = por %p836_p13, %p835_p12 }
  0x20   :  { %p838_p1 = pnand %p837_p0, %p831_p11 }
  0x22   :  { %841 = shalt.err (!%p838_p1)
}
  0x23   :  { %27 = dma.hbm_to_vmem [thread:$0]  %s1064_s0, 256, %s966_s27, [#allocation3], %s918_s13, %s918_s13, %s919_s14  }
  0x24   :  { %s920_s26 = smov [#allocation7]   ;;  %s921_s29 = smov [#allocation8]  }
  0x25   :  { %s47_s28 = sshll.u32 %s920_s26, 4  ;;  %s61_s30 = sshll.u32 %s921_s29, 4  ;;  %s48_s28 = int_to_ptr.vmem [resolvable:$true] %s47_s28  ;;  %s1003_s30 = int_to_ptr.vmem [resolvable:$true] %s61_s30 }
  0x26   :  { %s842_s10 = scalar_lea.hbm %s1067_s3, 4096 }
  0x27   :  { %p843_p2 = scmp.ne.s32.totalorder %s1067_s3, %s842_s10  ;;  %p846_p3 = scmp.lt.u32.totalorder %s842_s10, %s1067_s3 }
  0x29   :  { %p848_p4 = pnand %p846_p3, %p843_p2 }
  0x2b   :  { %851 = shalt.err (!%p848_p4)
}
  0x2c   :  { %s852_s0 = scalar_lea.vmem %s48_s28, 4096  ;;  %p857_p6 = scmp.lt.s32.totalorder %s48_s28, %s48_s28 }
  0x2d   :  { %p853_p5 = scmp.ne.s32.totalorder %s48_s28, %s852_s0  ;;  %p858_p7 = scmp.lt.s32.totalorder %s852_s0, %s852_s0 }
  0x2f   :  { %p859_p8 = por %p858_p7, %p857_p6 }
  0x31   :  { %p860_p9 = pnand %p859_p8, %p853_p5 }
  0x33   :  { %863 = shalt.err (!%p860_p9)
}
  0x34   :  { %53 = dma.hbm_to_vmem [thread:$0]  %s1067_s3, 4096, %s48_s28, [#allocation6], %s918_s13, %s918_s13, %s919_s14  }
  0x35   :  { %s864_s20 = scalar_lea.hbm %s1069_s5, 2048 }
  0x36   :  { %p865_p10 = scmp.ne.s32.totalorder %s1069_s5, %s864_s20  ;;  %p868_p11 = scmp.lt.u32.totalorder %s864_s20, %s1069_s5 }
  0x38   :  { %p870_p12 = pnand %p868_p11, %p865_p10 }
  0x3a   :  { %873 = shalt.err (!%p870_p12)
}
  0x3b   :  { %s874_s1 = scalar_lea.vmem %s1003_s30, 2048  ;;  %p879_p0 = scmp.lt.s32.totalorder %s1003_s30, %s1003_s30 }
  0x3c   :  { %p875_p13 = scmp.ne.s32.totalorder %s1003_s30, %s874_s1  ;;  %p880_p1 = scmp.lt.s32.totalorder %s874_s1, %s874_s1 }
  0x3e   :  { %p881_p2 = por %p880_p1, %p879_p0 }
  0x40   :  { %p882_p3 = pnand %p881_p2, %p875_p13 }
  0x42   :  { %885 = shalt.err (!%p882_p3)
}
  0x43   :  { %s922_s3 = smov 64   ;;  %s923_s13 = smov 4  }
  0x44   :  { %67 = dma.hbm_to_vmem [thread:$0]  %s1069_s5, 2048, %s1003_s30, [#allocation9], %s922_s3, %s922_s3, %s923_s13  }
  0x45   :  { %908 = dma.done.wait [#allocation3], 256  }
  0x46   :  { %909 = vsyncadd [#allocation3], 4294967040 }
  0x47   :  { %910 = dma.done.wait [#allocation6], 4608  }
  0x48   :  { %911 = vsyncadd [#allocation6], 4294962688 }
  0x49   :  { %912 = dma.done.wait [#allocation9], 2048  }
  0x4a   :  { %913 = vsyncadd [#allocation9], 4294965248  ;;  %v924_v0 = vmov 0   ;;  %v728_v1 = vld [vmem:[#allocation5 + $0x4] ss:$8 sps:$4 sm:$0xff]   ;;  %v83_v5 = vld [vmem:[#allocation2] sm:$0xff]  ;;  %v92_v51 = vlaneseq }
  0x4b   :  { %158 = vmatprep.mubr.bf16.mxu0 %v924_v0  ;;  %v730_v2 = vld [vmem:[#allocation5] ss:$8 sps:$4 sm:$0xff]   ;;  %126 = vmatprep.subr.bf16.mxu0 %v728_v1  ;;  %v731_v3 = vld [vmem:[#allocation5 + $0x14] ss:$8 sps:$4 sm:$0xff]   ;;  %v733_v4 = vld [vmem:[#allocation5 + $0x10] ss:$8 sps:$4 sm:$0xff]  }
  0x4c   :  { %127 = vmatpush1.bf16.msra.mxu0 %v730_v2  ;;  %v84_v6 = vld [vmem:[#allocation2 + $0x8] sm:$0xff]  ;;  %v734_v7 = vld [vmem:[#allocation7 + $0x4] ss:$8 sps:$4 sm:$0xff]   ;;  %v736_v8 = vld [vmem:[#allocation7] ss:$8 sps:$4 sm:$0xff]   ;;  %vm122_vm0 = vcmask 261120  }
  0x4d   :  { %128 = vmatprep.subr.bf16.mxu0 %v731_v3  ;;  %v737_v9 = vld [vmem:[#allocation7 + $0x14] ss:$8 sps:$4 sm:$0xff]   ;;  %v85_v10 = vpack.c.bf16 %v84_v6, %v83_v5  ;;  %379 = vmatprep.subr.bf16.mxu1 %v734_v7  ;;  %v739_v11 = vld [vmem:[#allocation7 + $0x10] ss:$8 sps:$4 sm:$0xff]   ;;  %v740_v12 = vld [vmem:[#allocation7 + $0x24] ss:$8 sps:$4 sm:$0xff]  }
  0x4e   :  { %380 = vmatpush1.bf16.msra.mxu1 %v736_v8  ;;  %v742_v13 = vld [vmem:[#allocation7 + $0x20] ss:$8 sps:$4 sm:$0xff]   ;;  %v743_v14 = vld [vmem:[#allocation7 + $0x34] ss:$8 sps:$4 sm:$0xff]   ;;  %v745_v15 = vld [vmem:[#allocation7 + $0x30] ss:$8 sps:$4 sm:$0xff]  }
  0x4f   :  { %381 = vmatprep.subr.bf16.mxu1 %v737_v9  ;;  %v746_v16 = vld [vmem:[#allocation7 + $0x44] ss:$8 sps:$4 sm:$0xff]   ;;  %v748_v17 = vld [vmem:[#allocation7 + $0x40] ss:$8 sps:$4 sm:$0xff]   ;;  %v749_v18 = vld [vmem:[#allocation7 + $0x54] ss:$8 sps:$4 sm:$0xff]  }
  0x50   :  { %129 = vmatpush1.bf16.msra.mxu0 %v733_v4  ;;  %v751_v19 = vld [vmem:[#allocation7 + $0x50] ss:$8 sps:$4 sm:$0xff]   ;;  %v752_v20 = vld [vmem:[#allocation7 + $0x64] ss:$8 sps:$4 sm:$0xff]   ;;  %v754_v21 = vld [vmem:[#allocation7 + $0x60] ss:$8 sps:$4 sm:$0xff]  }
  0x51   :  { %v755_v22 = vld [vmem:[#allocation7 + $0x74] ss:$8 sps:$4 sm:$0xff]   ;;  %v757_v23 = vld [vmem:[#allocation7 + $0x70] ss:$8 sps:$4 sm:$0xff]   ;;  %v758_v24 = vld [vmem:[#allocation7 + $0x84] ss:$8 sps:$4 sm:$0xff]  }
  0x52   :  { %382 = vmatpush1.bf16.msra.mxu1 %v739_v11  ;;  %v760_v25 = vld [vmem:[#allocation7 + $0x80] ss:$8 sps:$4 sm:$0xff]   ;;  %v761_v26 = vld [vmem:[#allocation7 + $0x94] ss:$8 sps:$4 sm:$0xff]   ;;  %v763_v27 = vld [vmem:[#allocation7 + $0x90] ss:$8 sps:$4 sm:$0xff]  }
  0x53   :  { %637 = vmatmul.mubr.msk.bf16.vlgmr.msra.gmra.mrb[0].mxu0 %vm122_vm0, %v85_v10  ;;  %383 = vmatprep.subr.bf16.mxu1 %v740_v12  ;;  %v764_v28 = vld [vmem:[#allocation7 + $0xa4] ss:$8 sps:$4 sm:$0xff]   ;;  %v766_v29 = vld [vmem:[#allocation7 + $0xa0] ss:$8 sps:$4 sm:$0xff]   ;;  %v767_v30 = vld [vmem:[#allocation7 + $0xb4] ss:$8 sps:$4 sm:$0xff]  }
  0x54   :  { %v769_v31 = vld [vmem:[#allocation7 + $0xb0] ss:$8 sps:$4 sm:$0xff]   ;;  %v770_v32 = vld [vmem:[#allocation7 + $0xc4] ss:$8 sps:$4 sm:$0xff]   ;;  %v772_v33 = vld [vmem:[#allocation7 + $0xc0] ss:$8 sps:$4 sm:$0xff]  }
  0x55   :  { %v773_v34 = vld [vmem:[#allocation7 + $0xd4] ss:$8 sps:$4 sm:$0xff]   ;;  %v775_v35 = vld [vmem:[#allocation7 + $0xd0] ss:$8 sps:$4 sm:$0xff]   ;;  %v776_v36 = vld [vmem:[#allocation7 + $0xe4] ss:$8 sps:$4 sm:$0xff]  }
  0x56   :  { %384 = vmatpush1.bf16.msra.mxu1 %v742_v13  ;;  %v778_v37 = vld [vmem:[#allocation7 + $0xe0] ss:$8 sps:$4 sm:$0xff]   ;;  %v779_v38 = vld [vmem:[#allocation7 + $0xf4] ss:$8 sps:$4 sm:$0xff]   ;;  %v781_v39 = vld [vmem:[#allocation7 + $0xf0] ss:$8 sps:$4 sm:$0xff]  }
  0x57   :  { %385 = vmatprep.subr.bf16.mxu1 %v743_v14  ;;  %v782_v40 = vld [vmem:[#allocation8 + $0x40] sm:$0xff]   ;;  %v784_v42 = vld [vmem:[#allocation8 + $0x48] sm:$0xff]   ;;  %v786_v44 = vld [vmem:[#allocation8 + $0x50] sm:$0xff]   ;;  %v93_v52 = vshrl.u32 %v92_v51, 7  ;;  %s925_s30 = smov [#allocation10]  }
  0x58   :  { %v783_v41 = vld [vmem:[#allocation8] sm:$0xff]   ;;  %696 = vmatprep.subr.bf16.mxu0 %v782_v40  ;;  %v785_v43 = vld [vmem:[#allocation8 + $0x8] sm:$0xff]   ;;  %v787_v45 = vld [vmem:[#allocation8 + $0x10] sm:$0xff]   ;;  %s619_s8 = sshll.u32 %s925_s30, 4  ;;  %s620_s8 = int_to_ptr.vmem [resolvable:$true] %s619_s8 }
  0x59   :  { %697 = vmatpush3.bf16.msra.mxu0 %v783_v41  ;;  %v788_v46 = vld [vmem:[#allocation8 + $0x58] sm:$0xff]   ;;  %v790_v48 = vld [vmem:[#allocation8 + $0x60] sm:$0xff]   ;;  %v792_v50 = vld [vmem:[#allocation8 + $0x68] sm:$0xff]   ;;  %v94_v53 = vsub.s32 0, %v93_v52  ;;  %v98_v55 = vsub.s32 1, %v93_v52  ;;  %s886_s9 = scalar_lea.vmem %s620_s8, 128  ;;  %p891_p5 = scmp.lt.s32.totalorder %s620_s8, %s620_s8 }
  0x5a   :  { %386 = vmatpush1.bf16.msra.mxu1 %v745_v15  ;;  %698 = vmatprep.subr.bf16.mxu0 %v784_v42  ;;  %v789_v47 = vld [vmem:[#allocation8 + $0x18] sm:$0xff]   ;;  %v791_v49 = vld [vmem:[#allocation8 + $0x20] sm:$0xff]   ;;  %v90_v54 = vld [vmem:[%s1066_s2] sm:$0x3]  ;;  %p887_p4 = scmp.ne.s32.totalorder %s620_s8, %s886_s9  ;;  %p892_p6 = scmp.lt.s32.totalorder %s886_s9, %s886_s9 }
  0x5b   :  { %387 = vmatprep.subr.bf16.mxu1 %v746_v16  ;;  %v95_v56 = vrot.slane %v90_v54, %v94_v53  ;;  %v99_v57 = vrot.slane %v90_v54, %v98_v55  ;;  %v793_v8 = vld [vmem:[#allocation8 + $0x28] sm:$0xff]   ;;  %v794_v9 = vld [vmem:[#allocation8 + $0x70] sm:$0xff]   ;;  %v796_v11 = vld [vmem:[#allocation8 + $0x78] sm:$0xff]  }
  0x5c   :  { %v795_v10 = vld [vmem:[#allocation8 + $0x30] sm:$0xff]   ;;  %v797_v12 = vld [vmem:[#allocation8 + $0x38] sm:$0xff]   ;;  %p893_p7 = por %p892_p6, %p891_p5 }
  0x5d   :  { %699 = vmatpush3.bf16.msra.mxu0 %v785_v43  ;;  %v207_v13 = vld [vmem:[%s1068_s4] sm:$0x3] }
  0x5e   :  { %388 = vmatpush1.bf16.msra.mxu1 %v748_v17  ;;  %700 = vmatprep.subr.bf16.mxu0 %v786_v44  ;;  %v212_v14 = vrot.slane %v207_v13, %v94_v53  ;;  %v216_v15 = vrot.slane %v207_v13, %v98_v55  ;;  %p894_p8 = pnand %p893_p7, %p887_p4 }
  0x5f   :  { %389 = vmatprep.subr.bf16.mxu1 %v749_v18 }
  0x61   :  { %701 = vmatpush3.bf16.msra.mxu0 %v787_v45 }
  0x62   :  { %390 = vmatpush1.bf16.msra.mxu1 %v751_v19  ;;  %702 = vmatprep.subr.bf16.mxu0 %v788_v46 }
  0x63   :  { %391 = vmatprep.subr.bf16.mxu1 %v752_v20 }
  0x65   :  { %703 = vmatpush3.bf16.msra.mxu0 %v789_v47 }
  0x66   :  { %392 = vmatpush1.bf16.msra.mxu1 %v754_v21  ;;  %704 = vmatprep.subr.bf16.mxu0 %v790_v48 }
  0x67   :  { %393 = vmatprep.subr.bf16.mxu1 %v755_v22 }
  0x69   :  { %705 = vmatpush3.bf16.msra.mxu0 %v791_v49 }
  0x6a   :  { %394 = vmatpush1.bf16.msra.mxu1 %v757_v23  ;;  %706 = vmatprep.subr.bf16.mxu0 %v792_v50 }
  0x6b   :  { %395 = vmatprep.subr.bf16.mxu1 %v758_v24 }
  0x6d   :  { %707 = vmatpush3.bf16.msra.mxu0 %v793_v8 }
  0x6e   :  { %396 = vmatpush1.bf16.msra.mxu1 %v760_v25  ;;  %708 = vmatprep.subr.bf16.mxu0 %v794_v9 }
  0x6f   :  { %397 = vmatprep.subr.bf16.mxu1 %v761_v26 }
  0x71   :  { %709 = vmatpush3.bf16.msra.mxu0 %v795_v10 }
  0x72   :  { %398 = vmatpush1.bf16.msra.mxu1 %v763_v27  ;;  %710 = vmatprep.subr.bf16.mxu0 %v796_v11 }
  0x73   :  { %399 = vmatprep.subr.bf16.mxu1 %v764_v28 }
  0x75   :  { %711 = vmatpush3.bf16.msra.mxu0 %v797_v12 }
  0x76   :  { %400 = vmatpush1.bf16.msra.mxu1 %v766_v29 }
  0x77   :  { %401 = vmatprep.subr.bf16.mxu1 %v767_v30 }
  0x7a   :  { %402 = vmatpush1.bf16.msra.mxu1 %v769_v31 }
  0x7b   :  { %403 = vmatprep.subr.bf16.mxu1 %v770_v32 }
  0x7e   :  { %404 = vmatpush1.bf16.msra.mxu1 %v772_v33 }
  0x7f   :  { %405 = vmatprep.subr.bf16.mxu1 %v773_v34  ;;  %v670_v34 = vld [vmem:[%s1070_s6] ss:$0 sm:$0xff] }
  0x82   :  { %406 = vmatpush1.bf16.msra.mxu1 %v775_v35 }
  0x83   :  { %407 = vmatprep.subr.bf16.mxu1 %v776_v36 }
  0x86   :  { %408 = vmatpush1.bf16.msra.mxu1 %v778_v37 }
  0x87   :  { %409 = vmatprep.subr.bf16.mxu1 %v779_v38 }
  0x8a   :  { %410 = vmatpush1.bf16.msra.mxu1 %v781_v39 }
 0x126   :  { %v160_v58 = vpop.f32.mrb[0].mxu0 }
 0x127   :  { %v161_v59 = vadd.f32 %v160_v58, %v95_v56  ;;  %v162_v60 = vpop.f32.mrb[1].mxu0 }
 0x128   :  { %v163_v61 = vadd.f32 %v162_v60, %v99_v57  ;;  %v164_v62 = vpop.f32.mrb[2].mxu0 }
 0x129   :  { %v165_v63 = vadd.f32 %v164_v62, %v95_v56  ;;  %v166_v0 = vpop.f32.mrb[3].mxu0  ;;  %v169_v2 = vmax.f32 %v161_v59, 0.0 }
 0x12a   :  { %v167_v1 = vadd.f32 %v166_v0, %v99_v57  ;;  %v170_v4 = vmax.f32 %v163_v61, 0.0 }
 0x12b   :  { %v171_v3 = vmax.f32 %v165_v63, 0.0 }
 0x12c   :  { %v172_v5 = vmax.f32 %v167_v1, 0.0 }
 0x12d   :  { %v173_v6 = vpack.c.bf16 %v171_v3, %v169_v2 }
 0x12e   :  { %v174_v7 = vpack.c.bf16 %v172_v5, %v170_v4 }
 0x130   :  { %411 = vmatprep.mubr.bf16.mxu1 %v174_v7 }
 0x131   :  { %412 = vmatmul.mubr.bf16.vlgmr.msra.gmra.mrb[0].mxu1 %v173_v6 }
 0x204   :  { %v413_v16 = vpop.f32.mrb[0].mxu1 }
 0x205   :  { %v414_v17 = vadd.f32 %v413_v16, %v212_v14  ;;  %v415_v18 = vpop.f32.mrb[1].mxu1 }
 0x206   :  { %v416_v19 = vadd.f32 %v415_v18, %v216_v15  ;;  %v417_v20 = vpop.f32.mrb[2].mxu1 }
 0x207   :  { %v418_v21 = vadd.f32 %v417_v20, %v212_v14  ;;  %v419_v22 = vpop.f32.mrb[3].mxu1  ;;  %v422_v24 = vmax.f32 %v414_v17, 0.0 }
 0x208   :  { %v420_v23 = vadd.f32 %v419_v22, %v216_v15  ;;  %v423_v26 = vmax.f32 %v416_v19, 0.0 }
 0x209   :  { %v424_v25 = vmax.f32 %v418_v21, 0.0 }
 0x20a   :  { %v425_v27 = vmax.f32 %v420_v23, 0.0 }
 0x20b   :  { %v426_v28 = vpack.c.bf16 %v424_v25, %v422_v24 }
 0x20c   :  { %v427_v29 = vpack.c.bf16 %v425_v27, %v423_v26 }
 0x20e   :  { %595 = vmatprep.mubr.bf16.mxu0 %v427_v29 }
 0x20f   :  { %596 = vmatmul.mubr.bf16.vlgmr.msra.gmra.mrb[4].mxu0 %v426_v28 }
 0x2e2   :  { %v712_v30 = vpop.f32.mrb[4].mxu0 }
 0x2e3   :  { %v713_v31 = vpop.f32.mrb[5].mxu0 }
 0x2e4   :  { %v714_v32 = vadd.f32 %v713_v31, %v712_v30  ;;  %v715_v33 = vpop.f32.mrb[6].mxu0 }
 0x2e5   :  { %v716_v35 = vpop.f32.mrb[7].mxu0 }
 0x2e6   :  { %v717_v36 = vadd.f32 %v716_v35, %v715_v33  ;;  %v598_v37 = vadd.f32 %v714_v32, %v670_v34 }
 0x2e8   :  { %v601_v38 = vadd.f32 %v717_v36, %v670_v34 }
 0x2ea   :  { %v694_v39 = vpack.c.bf16 %v601_v38, %v598_v37 }
 0x2ec   :  { %695 = vst [vmem:[#allocation10] sm:$0xff] %v694_v39  }
 0x2ed   :  { %897 = shalt.err (!%p894_p8)
}
 0x2ee   :  { %s898_s6 = scalar_lea.hbm %s1071_s7, 128 }
 0x2ef   :  { %p899_p9 = scmp.ne.s32.totalorder %s1071_s7, %s898_s6  ;;  %p902_p10 = scmp.lt.u32.totalorder %s898_s6, %s1071_s7 }
 0x2f1   :  { %p904_p11 = pnand %p902_p10, %p899_p9 }
 0x2f3   :  { %907 = shalt.err (!%p904_p11)
}
 0x2f4   :  { %625 = dma.vmem_to_hbm [thread:$0]  %s620_s8, 128, %s1071_s7, [#allocation4], %s922_s3, %s922_s3, %s923_s13  }
 0x2f5   :  { %914 = dma.done.wait [#allocation4], 128  }
 0x2f6   :  { %915 = vsyncadd [#allocation4], 4294967168 }
 0x2f7   :  { %629 = vsyncpa [#allocation3], 1 }
 0x2f8   :  { %630 = vsyncpa [#allocation6], 1 }
 0x2f9   :  { %631 = vsyncpa [#allocation9], 1 }
 0x2fa   :  { %632 = vsyncpa [#allocation4], 1 }

</bundles_post_ra>
